<compile_context>
chip_gen: v7x
topology: tpu7x:2x2x1
jax: 0.10.0
libtpu: 0.0.40
codegen_flags: <defaults>
</compile_context>

<pallas_src>
import jax
import jax.numpy as jnp
from jax import lax
from jax.experimental import pallas as pl
from jax.experimental.pallas import tpu as pltpu

KH, KW = 28, 28
C_IN, C_OUT = 1, 10
K = C_IN * KH * KW            # 784, contraction dim
LANE = 128                    # batch tile must be a multiple of this (lane-dense output)
TN_CAP_P1 = 2048              # batch-tile cap for the 28x28 (single spatial position) fast path
TN_CAP_PN = 1024              # batch-tile cap when several spatial positions share a grid step
G_MAX = 8                     # spatial positions folded into one grid step (P > 1 only)


def _round_up(v, m):
    return ((v + m - 1) // m) * m


def conv_tanh_max_kernel(w_ref, p_ref, b_ref, o_ref):
    # w_ref: (C_OUT, K)   bf16 flattened conv weight, VMEM-resident across the grid
    # p_ref: (G, TN, K)   bf16 patches: G spatial positions x TN batch rows
    # b_ref: (C_OUT, 1)   f32 bias
    # o_ref: (C_OUT, TN)  f32 output tile; same block across the spatial grid axis,
    #                     so it doubles as the running-max accumulator (no scratch).
    sp = pl.program_id(1)                       # spatial (reduction) axis, last in grid

    @pl.when(sp == 0)
    def _init():
        o_ref[...] = jnp.full(o_ref.shape, -jnp.inf, o_ref.dtype)

    w = w_ref[...]
    cur = o_ref[...]
    for gi in range(p_ref.shape[0]):            # static unroll; G is a small Python int
        # (C_OUT, K) . (TN, K)^T -> (C_OUT, TN): batch on lanes, f32 accumulation on the MXU.
        scores = lax.dot_general(
            w, p_ref[gi],
            dimension_numbers=(((1,), (1,)), ((), ())),
            preferred_element_type=jnp.float32,
        )
        cur = jnp.maximum(cur, scores)
    o_ref[...] = cur

    @pl.when(sp == pl.num_programs(1) - 1)
    def _finalize():
        # max(tanh(s + b)) == tanh(max(s) + b): bias-add + tanh only on the reduced tile.
        o_ref[...] = jnp.tanh(o_ref[...] + b_ref[...])


def _extract_patches_bf16(x_bf16):
    """x_bf16: (N, 1, H, W) bf16 -> patches (P, N, K), P = (H-27)*(W-27)."""
    n, _, h, w = x_bf16.shape
    if (h, w) == (KH, KW):
        # P == 1: im2col degenerates to a pure metadata reshape (no HBM pass, no transpose).
        return x_bf16.reshape(1, n, K)
    # General case: one XLA pass; feature ordering is (C, KH, KW), which matches the OIHW
    # weight flatten only because C_IN == 1 (re-verify before generalizing to C_IN > 1).
    pt = lax.conv_general_dilated_patches(
        x_bf16, filter_shape=(KH, KW), window_strides=(1, 1), padding="VALID")
    ho, wo = pt.shape[2], pt.shape[3]
    return pt.reshape(n, K, ho * wo).transpose(2, 0, 1)
    # TODO(synk): for large H*W, skip patch materialization entirely: keep x in HBM
    # (memory_space=pl.ANY) and DMA the 28-row x W window per spatial tile inside the kernel.


def baseline_forward(x, conv_w, conv_b):
    """x: (N, 1, H, W) f32; conv_w: (10, 1, 28, 28); conv_b: (10,). Returns (N, 10) f32."""
    n = x.shape[0]

    # Cast to bf16 BEFORE extraction / padding: halves wrapper HBM bytes for this HBM-bound op.
    x_bf16 = x.astype(jnp.bfloat16)
    patches = _extract_patches_bf16(x_bf16)          # (P, N, K) bf16
    p_spatial = patches.shape[0]

    # Spatial blocking: fold G positions into each grid step; pad P with edge copies
    # (duplicating a position cannot change the max).
    g = 1 if p_spatial == 1 else min(G_MAX, p_spatial)
    p_pad = _round_up(p_spatial, g)
    if p_pad != p_spatial:
        patches = jnp.pad(patches, ((0, p_pad - p_spatial), (0, 0), (0, 0)), mode="edge")

    # Batch tile: always a multiple of 128 lanes, and >= 2 tiles once the padded batch reaches
    # 256 so both v7x TensorCores are used on the "parallel" grid axis.
    n_pad = _round_up(max(n, 1), LANE)
    tn_cap = TN_CAP_P1 if p_pad == 1 else TN_CAP_PN
    if n_pad >= 2 * LANE:
        tn = min(tn_cap, _round_up((n_pad + 1) // 2, LANE))
    else:
        tn = n_pad
    n_pad = _round_up(n_pad, tn)
    if n_pad != n:
        patches = jnp.pad(patches, ((0, 0), (0, n_pad - n), (0, 0)))

    w_bf16 = conv_w.reshape(C_OUT, K).astype(jnp.bfloat16)
    b2d = conv_b.astype(jnp.float32).reshape(C_OUT, 1)

    # VMEM budget: double-buffered patch blocks + weight + output tile, with headroom.
    patch_block_bytes = g * tn * K * 2
    vmem_limit = int(max(32 << 20, 3 * patch_block_bytes + (4 << 20)))

    out = pl.pallas_call(
        conv_tanh_max_kernel,
        out_shape=jax.ShapeDtypeStruct((C_OUT, n_pad), jnp.float32),
        grid_spec=pltpu.PrefetchScalarGridSpec(
            num_scalar_prefetch=0,
            grid=(n_pad // tn, p_pad // g),
            in_specs=[
                pl.BlockSpec((C_OUT, K), lambda i, p: (0, 0)),
                pl.BlockSpec((g, tn, K), lambda i, p: (p, i, 0)),
                pl.BlockSpec((C_OUT, 1), lambda i, p: (0, 0)),
            ],
            out_specs=pl.BlockSpec((C_OUT, tn), lambda i, p: (0, i)),
        ),
        compiler_params=pltpu.CompilerParams(
            dimension_semantics=("parallel", "arbitrary"),
            vmem_limit_bytes=vmem_limit),
    )(w_bf16, patches, b2d)

    return out[:, :n].T                              # (N, C_OUT), PyTorch layout


def reference_forward(x, conv_w, conv_b):
    # Plain-JAX reference of the PyTorch forward (for sanity checking).
    y = lax.conv_general_dilated(
        x, conv_w, window_strides=(1, 1), padding="VALID",
        dimension_numbers=("NCHW", "OIHW", "NCHW"),
    ) + conv_b[None, :, None, None]
    y = jnp.tanh(y)
    return jnp.max(jnp.max(y, axis=-1), axis=-1)


if __name__ == "__main__":
    key = jax.random.PRNGKey(0)
    kx, kw, kb = jax.random.split(key, 3)

    # PyTorch Conv2d default init: uniform(-1/sqrt(fan_in), +1/sqrt(fan_in)).
    fan_in = C_IN * KH * KW
    bound = 1.0 / (fan_in ** 0.5)
    conv_w = jax.random.uniform(kw, (C_OUT, C_IN, KH, KW), jnp.float32, -bound, bound)
    conv_b = jax.random.uniform(kb, (C_OUT,), jnp.float32, -bound, bound)

    # Kernel size 28 forces H, W >= 28; MNIST-like 28x28, small batch.
    x = jax.random.normal(kx, (8, 1, 28, 28), jnp.float32)

    fwd = jax.jit(baseline_forward)
    out = jax.block_until_ready(fwd(x, conv_w, conv_b))
    assert out.shape == (8, C_OUT)

    # Compare against an f32 XLA reference evaluated on the same bf16-rounded inputs
    # (the kernel casts inputs/weights to bf16 for MXU throughput, f32 accumulation).
    x_q = x.astype(jnp.bfloat16).astype(jnp.float32)
    w_q = conv_w.astype(jnp.bfloat16).astype(jnp.float32)
    ref = jax.block_until_ready(reference_forward(x_q, w_q, conv_b))
    err = float(jnp.max(jnp.abs(out - ref)))
    assert err < 1e-2, f"max abs err {err}"

    print("KERNEL_OK")
</pallas_src>

<mosaic_0001>
module attributes {stable_mosaic.version = 11 : i64} {
  func.func @conv_tanh_max_kernel(%arg0: i32, %arg1: i32, %arg2: memref<10x784xbf16, #tpu.memory_space<vmem>>, %arg3: memref<1x128x784xbf16, #tpu.memory_space<vmem>>, %arg4: memref<10x1xf32, #tpu.memory_space<vmem>>, %arg5: memref<10x128xf32, #tpu.memory_space<vmem>>) attributes {dimension_semantics = [#tpu.dimension_semantics<parallel>, #tpu.dimension_semantics<arbitrary>], iteration_bounds = array<i64: 1, 1>, scalar_prefetch = 0 : i64, scratch_operands = 0 : i64, tpu.core_type = #tpu.core_type<tc>, window_params = [{pipeline_mode = #tpu.pipeline_mode<synchronous>, transform_indices = @transform_0, window_bounds = array<i64: 10, 784>}, {transform_indices = @transform_1, window_bounds = array<i64: 1, 128, 784>}, {pipeline_mode = #tpu.pipeline_mode<synchronous>, transform_indices = @transform_2, window_bounds = array<i64: 10, 1>}, {transform_indices = @transform_3, window_bounds = array<i64: 10, 128>}]} {
    %c0_i32 = arith.constant 0 : i32
    %0 = arith.cmpi eq, %arg1, %c0_i32 : i32
    %1 = arith.extui %0 : i1 to i32
    %c0_i32_0 = arith.constant 0 : i32
    %2 = arith.cmpi ne, %1, %c0_i32_0 : i32
    scf.if %2 {
      %cst_11 = arith.constant 0xFF800000 : f32
      %13 = vector.broadcast %cst_11 : f32 to vector<10x128xf32>
      %c0_12 = arith.constant 0 : index
      %c0_13 = arith.constant 0 : index
      %14 = vector.load %arg5[%c0_12, %c0_13] : memref<10x128xf32, #tpu.memory_space<vmem>>, vector<10x128xf32>
      tpu.vector_store %arg5[%c0_12, %c0_13], %13 {strides = array<i32>} : memref<10x128xf32, #tpu.memory_space<vmem>>, vector<10x128xf32>,
    } else {
    }
    %c0 = arith.constant 0 : index
    %c0_1 = arith.constant 0 : index
    %3 = vector.load %arg2[%c0, %c0_1] : memref<10x784xbf16, #tpu.memory_space<vmem>>, vector<10x784xbf16>
    %c0_2 = arith.constant 0 : index
    %c0_3 = arith.constant 0 : index
    %4 = vector.load %arg5[%c0_2, %c0_3] : memref<10x128xf32, #tpu.memory_space<vmem>>, vector<10x128xf32>
    %c0_4 = arith.constant 0 : index
    %c0_5 = arith.constant 0 : index
    %c0_6 = arith.constant 0 : index
    %5 = vector.load %arg3[%c0_4, %c0_5, %c0_6] : memref<1x128x784xbf16, #tpu.memory_space<vmem>>, vector<1x128x784xbf16>
    %6 = vector.shape_cast %5 : vector<1x128x784xbf16> to vector<128x784xbf16>
    %cst = arith.constant dense<0.000000e+00> : vector<10x128xf32>
    %7 = tpu.matmul %3, %6, %cst {dimension_numbers = #tpu.dot_dimension_numbers<[1], [1], [0], [0], [0, 0, 1, 0], [], []>} : vector<10x784xbf16>, vector<128x784xbf16>, vector<10x128xf32> -> vector<10x128xf32>
    %8 = arith.maximumf %4, %7 : vector<10x128xf32>
    %c0_7 = arith.constant 0 : index
    %c0_8 = arith.constant 0 : index
    %9 = vector.load %arg5[%c0_7, %c0_8] : memref<10x128xf32, #tpu.memory_space<vmem>>, vector<10x128xf32>
    tpu.vector_store %arg5[%c0_7, %c0_8], %8 {strides = array<i32>} : memref<10x128xf32, #tpu.memory_space<vmem>>, vector<10x128xf32>,
    %c0_i32_9 = arith.constant 0 : i32
    %10 = arith.cmpi eq, %arg1, %c0_i32_9 : i32
    %11 = arith.extui %10 : i1 to i32
    %c0_i32_10 = arith.constant 0 : i32
    %12 = arith.cmpi ne, %11, %c0_i32_10 : i32
    scf.if %12 {
      %c0_11 = arith.constant 0 : index
      %c0_12 = arith.constant 0 : index
      %13 = vector.load %arg5[%c0_11, %c0_12] : memref<10x128xf32, #tpu.memory_space<vmem>>, vector<10x128xf32>
      %c0_13 = arith.constant 0 : index
      %c0_14 = arith.constant 0 : index
      %14 = vector.load %arg4[%c0_13, %c0_14] : memref<10x1xf32, #tpu.memory_space<vmem>>, vector<10x1xf32>
      %15 = vector.broadcast %14 : vector<10x1xf32> to vector<10x128xf32>
      %16 = arith.addf %13, %15 : vector<10x128xf32>
      %17 = math.tanh %16 : vector<10x128xf32>
      %c0_15 = arith.constant 0 : index
      %c0_16 = arith.constant 0 : index
      %18 = vector.load %arg5[%c0_15, %c0_16] : memref<10x128xf32, #tpu.memory_space<vmem>>, vector<10x128xf32>
      tpu.vector_store %arg5[%c0_15, %c0_16], %17 {strides = array<i32>} : memref<10x128xf32, #tpu.memory_space<vmem>>, vector<10x128xf32>,
    } else {
    }
    return
  }
  func.func @transform_0(%arg0: i32, %arg1: i32) -> (i32, i32) {
    %c0_i32 = arith.constant 0 : i32
    %c0_i32_0 = arith.constant 0 : i32
    %c0_i32_1 = arith.constant 0 : i32
    return %c0_i32, %c0_i32_0 : i32, i32
  }
  func.func @transform_1(%arg0: i32, %arg1: i32) -> (i32, i32, i32) {
    %c0_i32 = arith.constant 0 : i32
    %c0_i32_0 = arith.constant 0 : i32
    return %arg1, %arg0, %c0_i32 : i32, i32, i32
  }
  func.func @transform_2(%arg0: i32, %arg1: i32) -> (i32, i32) {
    %c0_i32 = arith.constant 0 : i32
    %c0_i32_0 = arith.constant 0 : i32
    %c0_i32_1 = arith.constant 0 : i32
    return %c0_i32, %c0_i32_0 : i32, i32
  }
  func.func @transform_3(%arg0: i32, %arg1: i32) -> (i32, i32) {
    %c0_i32 = arith.constant 0 : i32
    %c0_i32_0 = arith.constant 0 : i32
    return %c0_i32, %arg0 : i32, i32
  }
}

</mosaic_0001>

<bundles_post_ra>
// kernel: baseline_forward.1
= control target key start
LH: loop header
LB: loop body
LE: loop exit
PB: predicated region body
PF: predicated region fallthrough
CT: control target
= control target key end

     0   :  { %v835_v6 = vmov 0   ;;  %v836_v38 = vmov 0.0   ;;  %vm410_vm0 = vcmask 130048   ;;  %vm837_vm1 = vmmov 0   ;;  %s1090_s1 = inlined_call_operand.vmem [shape: bf16[1,128,784], index: 1, kind: input, shape index: {}]   ;;  %s1091_s0 = inlined_call_operand.vmem [shape: bf16[10,784], index: 0, kind: input, shape index: {}]   ;;  %s1092_s2 = inlined_call_operand.vmem [shape: f32[10,1], index: 2, kind: input, shape index: {}]   ;;  %s1093_s3 = inlined_call_operand.vmem [shape: f32[10,128], index: 3, kind: output, shape index: {}]  }
   0x1   :  { %v741_v0 = vld [vmem:[%s1090_s1 + $0x4] ss:$28 sps:$4 sm:$0xff]   ;;  %v743_v1 = vld [vmem:[%s1090_s1 + $0x14] ss:$28 sps:$4 sm:$0xff]   ;;  %v747_v4 = vld [vmem:[%s1090_s1 + $0x3c] ss:$28 sps:$4 sm:$0xff]   ;;  %740 = vset.pattern.permute.xlu0 %v835_v6 }
   0x2   :  { %438 = vmatprep.subr.bf16.mxu1 %v741_v0  ;;  %v745_v2 = vld [vmem:[%s1090_s1] ss:$28 sps:$4 sm:$0xff]   ;;  %v746_v3 = vld [vmem:[%s1090_s1 + $0x10] ss:$28 sps:$4 sm:$0xff]   ;;  %520 = vmatprep.subr.bf16.mxu0 %v743_v1  ;;  %v751_v7 = vld [vmem:[%s1090_s1 + $0x38] ss:$28 sps:$4 sm:$0xff]  }
   0x3   :  { %439 = vmatpush1.bf16.xpose.msra.mxu1 %v745_v2  ;;  %521 = vmatpush1.bf16.xpose.msra.mxu0 %v746_v3  ;;  %v749_v5 = vld [vmem:[%s1090_s1 + $0x4c] ss:$28 sps:$4 sm:$0xff]   ;;  %v753_v9 = vld [vmem:[%s1090_s1 + $0x74] ss:$28 sps:$4 sm:$0xff]   ;;  %v755_v10 = vld [vmem:[%s1090_s1 + $0x84] ss:$28 sps:$4 sm:$0xff]  }
   0x4   :  { %440 = vmatprep.subr.bf16.mxu1 %v747_v4  ;;  %522 = vmatprep.subr.bf16.mxu0 %v749_v5  ;;  %v752_v8 = vld [vmem:[%s1090_s1 + $0x48] ss:$28 sps:$4 sm:$0xff]   ;;  %v757_v11 = vld [vmem:[%s1090_s1 + $0x70] ss:$28 sps:$4 sm:$0xff]   ;;  %v758_v12 = vld [vmem:[%s1090_s1 + $0x80] ss:$28 sps:$4 sm:$0xff]  }
   0x5   :  { %v759_v13 = vld [vmem:[%s1090_s1 + $0xac] ss:$28 sps:$4 sm:$0xff]   ;;  %v761_v14 = vld [vmem:[%s1090_s1 + $0xbc] ss:$28 sps:$4 sm:$0xff]   ;;  %v765_v18 = vld [vmem:[%s1090_s1 + $0xe4] ss:$28 sps:$4 sm:$0xff]  }
   0x6   :  { %v763_v15 = vld [vmem:[%s1090_s1 + $0xa8] ss:$28 sps:$4 sm:$0xff]   ;;  %v764_v17 = vld [vmem:[%s1090_s1 + $0xb8] ss:$28 sps:$4 sm:$0xff]   ;;  %v769_v21 = vld [vmem:[%s1090_s1 + $0xe0] ss:$28 sps:$4 sm:$0xff]  }
   0x7   :  { %v791_v16 = vld [vmem:[%s1091_s0 + $0x4] ss:$28 sps:$4 sm:$0x1f]   ;;  %v767_v19 = vld [vmem:[%s1090_s1 + $0xf4] ss:$28 sps:$4 sm:$0xff]  }
   0x8   :  { %470 = vmatprep.mubr.bf16.mxu1 %v791_v16  ;;  %v797_v20 = vld [vmem:[%s1091_s0 + $0x14] ss:$28 sps:$4 sm:$0x1f]   ;;  %v771_v23 = vld [vmem:[%s1090_s1 + $0x11c] ss:$28 sps:$4 sm:$0xff]   ;;  %v611_v29 = vld [vmem:[%s1092_s2] sm:$0xff] }
   0x9   :  { %552 = vmatprep.mubr.bf16.mxu0 %v797_v20  ;;  %v770_v22 = vld [vmem:[%s1090_s1 + $0xf0] ss:$28 sps:$4 sm:$0xff]   ;;  %v775_v25 = vld [vmem:[%s1090_s1 + $0x118] ss:$28 sps:$4 sm:$0xff]   ;;  %v776_v26 = vld [vmem:[%s1090_s1 + $0x128] ss:$28 sps:$4 sm:$0xff]   ;;  %615 = vperm.xlu0 %740, %v611_v29  }
   0xa   :  { %v773_v24 = vld [vmem:[%s1090_s1 + $0x12c] ss:$28 sps:$4 sm:$0xff]   ;;  %v777_v27 = vld [vmem:[%s1090_s1 + $0x154] ss:$28 sps:$4 sm:$0xff]   ;;  %v779_v28 = vld [vmem:[%s1090_s1 + $0x164] ss:$28 sps:$4 sm:$0xff]  }
   0xb   :  { %441 = vmatpush1.bf16.xpose.msra.mxu1 %v751_v7  ;;  %523 = vmatpush1.bf16.xpose.msra.mxu0 %v752_v8  ;;  %v612_v30 = vld [vmem:[%s1092_s2 + $0x8] sm:$0x3]  ;;  %v781_v31 = vld [vmem:[%s1090_s1 + $0x150] ss:$28 sps:$4 sm:$0xff]   ;;  %v782_v32 = vld [vmem:[%s1090_s1 + $0x160] ss:$28 sps:$4 sm:$0xff]  }
   0xc   :  { %442 = vmatprep.subr.bf16.mxu1 %v753_v9  ;;  %524 = vmatprep.subr.bf16.mxu0 %v755_v10  ;;  %v783_v33 = vld [vmem:[%s1090_s1 + $0x18c] ss:$28 sps:$4 sm:$0xff]   ;;  %v785_v34 = vld [vmem:[%s1090_s1 + $0x19c] ss:$28 sps:$4 sm:$0xff]   ;;  %v801_v44 = vld [vmem:[%s1090_s1 + $0x44] ss:$28 sps:$4 sm:$0xff]  }
   0xd   :  { %620 = vperm.xlu0 %740, %v612_v30   ;;  %v787_v35 = vld [vmem:[%s1090_s1 + $0x188] ss:$28 sps:$4 sm:$0xff]   ;;  %v788_v36 = vld [vmem:[%s1090_s1 + $0x198] ss:$28 sps:$4 sm:$0xff]   ;;  %v802_v46 = vld [vmem:[%s1090_s1 + $0x50] ss:$28 sps:$4 sm:$0xff]  }
   0xe   :  { %v794_v37 = vld [vmem:[%s1090_s1 + $0xc] ss:$28 sps:$4 sm:$0xff]   ;;  %v798_v39 = vld [vmem:[%s1090_s1 + $0x18] ss:$28 sps:$4 sm:$0xff]   ;;  %v799_v47 = vld [vmem:[%s1090_s1 + $0x40] ss:$28 sps:$4 sm:$0xff]  }
   0xf   :  { %v789_v40 = vld [vmem:[%s1091_s0] ss:$28 sps:$4 sm:$0x1f]   ;;  %v795_v41 = vld [vmem:[%s1091_s0 + $0x10] ss:$28 sps:$4 sm:$0x1f]  }
  0x10   :  { %v792_v42 = vld [vmem:[%s1090_s1 + $0x8] ss:$28 sps:$4 sm:$0xff]   ;;  %v415_v43 = vsel %vm410_vm0, %v798_v39, 0  ;;  %v418_v48 = vsel %vm410_vm0, %v802_v46, 0  ;;  %v805_v49 = vld [vmem:[%s1090_s1 + $0x7c] ss:$28 sps:$4 sm:$0xff]  }
  0x11   :  { %v829_v45 = vld [vmem:[%s1091_s0 + $0xc] ss:$28 sps:$4 sm:$0x1f]   ;;  %v803_v51 = vld [vmem:[%s1090_s1 + $0x78] ss:$28 sps:$4 sm:$0xff]  }
  0x12   :  { %v806_v50 = vld [vmem:[%s1090_s1 + $0x88] ss:$28 sps:$4 sm:$0xff]   ;;  %v809_v53 = vld [vmem:[%s1090_s1 + $0xb4] ss:$28 sps:$4 sm:$0xff]   ;;  %v810_v54 = vld [vmem:[%s1090_s1 + $0xc0] ss:$28 sps:$4 sm:$0xff]  }
  0x13   :  { %443 = vmatpush1.bf16.xpose.msra.mxu1 %v757_v11  ;;  %525 = vmatpush1.bf16.xpose.msra.mxu0 %v758_v12  ;;  %v421_v52 = vsel %vm410_vm0, %v806_v50, 0  ;;  %v807_v55 = vld [vmem:[%s1090_s1 + $0xb0] ss:$28 sps:$4 sm:$0xff]   ;;  %v424_v56 = vsel %vm410_vm0, %v810_v54, 0  ;;  %v814_v58 = vld [vmem:[%s1090_s1 + $0xf8] ss:$28 sps:$4 sm:$0xff]  }
  0x14   :  { %444 = vmatprep.subr.bf16.mxu1 %v759_v13  ;;  %526 = vmatprep.subr.bf16.mxu0 %v761_v14  ;;  %v813_v57 = vld [vmem:[%s1090_s1 + $0xec] ss:$28 sps:$4 sm:$0xff]   ;;  %v427_v60 = vsel %vm410_vm0, %v814_v58, 0  ;;  %v817_v61 = vld [vmem:[%s1090_s1 + $0x124] ss:$28 sps:$4 sm:$0xff]   ;;  %v838_v11 = vmov -inf  }
  0x15   :  { %v811_v59 = vld [vmem:[%s1090_s1 + $0xe8] ss:$28 sps:$4 sm:$0xff]   ;;  %v818_v62 = vld [vmem:[%s1090_s1 + $0x130] ss:$28 sps:$4 sm:$0xff]   ;;  %v815_v63 = vld [vmem:[%s1090_s1 + $0x120] ss:$28 sps:$4 sm:$0xff]  }
  0x16   :  { %v430_v0 = vsel %vm410_vm0, %v818_v62, 0  ;;  %v821_v1 = vld [vmem:[%s1090_s1 + $0x15c] ss:$28 sps:$4 sm:$0xff]   ;;  %v822_v2 = vld [vmem:[%s1090_s1 + $0x168] ss:$28 sps:$4 sm:$0xff]  }
  0x17   :  { %v819_v3 = vld [vmem:[%s1090_s1 + $0x158] ss:$28 sps:$4 sm:$0xff]   ;;  %v433_v4 = vsel %vm410_vm0, %v822_v2, 0  ;;  %v826_v6 = vld [vmem:[%s1090_s1 + $0x1a0] ss:$28 sps:$4 sm:$0xff]  }
  0x18   :  { %v825_v5 = vld [vmem:[%s1090_s1 + $0x194] ss:$28 sps:$4 sm:$0xff]   ;;  %v436_v8 = vsel %vm410_vm0, %v826_v6, 0  ;;  %v827_v9 = vld [vmem:[%s1091_s0 + $0x8] ss:$28 sps:$4 sm:$0x1f]  }
  0x19   :  { %v823_v7 = vld [vmem:[%s1090_s1 + $0x190] ss:$28 sps:$4 sm:$0xff]   ;;  %v830_v10 = vld [vmem:[%s1091_s0 + $0x18] ss:$28 sps:$4 sm:$0x1f]  }
  0x1a   :  { %20 = vst [vmem:[%s1093_s3 + $0x8] sm:$0x3] %v838_v11 }
  0x1b   :  { %445 = vmatpush1.bf16.xpose.msra.mxu1 %v763_v15  ;;  %527 = vmatpush1.bf16.xpose.msra.mxu0 %v764_v17 }
  0x1c   :  { %446 = vmatprep.subr.bf16.mxu1 %v765_v18  ;;  %528 = vmatprep.subr.bf16.mxu0 %v767_v19 }
  0x21   :  { %v30_v19 = vld [vmem:[%s1093_s3 + $0x8] sm:$0x3] }
  0x23   :  { %447 = vmatpush1.bf16.xpose.msra.mxu1 %v769_v21  ;;  %529 = vmatpush1.bf16.xpose.msra.mxu0 %v770_v22 }
  0x24   :  { %448 = vmatprep.subr.bf16.mxu1 %v771_v23  ;;  %530 = vmatprep.subr.bf16.mxu0 %v773_v24 }
  0x2b   :  { %449 = vmatpush1.bf16.xpose.msra.mxu1 %v775_v25  ;;  %531 = vmatpush1.bf16.xpose.msra.mxu0 %v776_v26 }
  0x2c   :  { %450 = vmatprep.subr.bf16.mxu1 %v777_v27  ;;  %532 = vmatprep.subr.bf16.mxu0 %v779_v28 }
  0x33   :  { %451 = vmatpush1.bf16.xpose.msra.mxu1 %v781_v31  ;;  %533 = vmatpush1.bf16.xpose.msra.mxu0 %v782_v32 }
  0x34   :  { %452 = vmatprep.subr.bf16.mxu1 %v783_v33  ;;  %534 = vmatprep.subr.bf16.mxu0 %v785_v34 }
  0x3b   :  { %453 = vmatpush1.bf16.xpose.msra.mxu1 %v787_v35  ;;  %535 = vmatpush1.bf16.xpose.msra.mxu0 %v788_v36 }
  0x3c   :  { %479 = vmatprep.subr.bf16.mxu1 %v794_v37  ;;  %706 = vmatprep.subr.bf16.mxu0 %v836_v38 }
  0x42   :  { %471 = vmatmul.mubr.bf16.vlgmr.msra.gmra.mrb[0].mxu1 %v789_v40  ;;  %553 = vmatmul.mubr.bf16.vlgmr.msra.gmra.mrb[0].mxu0 %v795_v41 }
  0x43   :  { %480 = vmatpush1.bf16.xpose.msra.mxu1 %v792_v42  ;;  %707 = vmatpush3.bf16.xpose.msra.mxu0 %v415_v43 }
  0x44   :  { %481 = vmatprep.subr.bf16.mxu1 %v801_v44  ;;  %708 = vmatprep.subr.bf16.mxu0 %v836_v38 }
  0x45   :  { %511 = vmatprep.mubr.bf16.mxu1 %v829_v45  ;;  %722 = vmatprep.mubr.msk.bf16.mxu0 %vm837_vm1, %v836_v38 }
  0x4b   :  { %482 = vmatpush1.bf16.xpose.msra.mxu1 %v799_v47  ;;  %709 = vmatpush3.bf16.xpose.msra.mxu0 %v418_v48 }
  0x4c   :  { %483 = vmatprep.subr.bf16.mxu1 %v805_v49  ;;  %710 = vmatprep.subr.bf16.mxu0 %v836_v38 }
  0x53   :  { %484 = vmatpush1.bf16.xpose.msra.mxu1 %v803_v51  ;;  %711 = vmatpush3.bf16.xpose.msra.mxu0 %v421_v52 }
  0x54   :  { %485 = vmatprep.subr.bf16.mxu1 %v809_v53  ;;  %712 = vmatprep.subr.bf16.mxu0 %v836_v38 }
  0x5b   :  { %486 = vmatpush1.bf16.xpose.msra.mxu1 %v807_v55  ;;  %713 = vmatpush3.bf16.xpose.msra.mxu0 %v424_v56 }
  0x5c   :  { %487 = vmatprep.subr.bf16.mxu1 %v813_v57  ;;  %714 = vmatprep.subr.bf16.mxu0 %v836_v38 }
  0x63   :  { %488 = vmatpush1.bf16.xpose.msra.mxu1 %v811_v59  ;;  %715 = vmatpush3.bf16.xpose.msra.mxu0 %v427_v60 }
  0x64   :  { %489 = vmatprep.subr.bf16.mxu1 %v817_v61  ;;  %716 = vmatprep.subr.bf16.mxu0 %v836_v38 }
  0x6b   :  { %490 = vmatpush1.bf16.xpose.msra.mxu1 %v815_v63  ;;  %717 = vmatpush3.bf16.xpose.msra.mxu0 %v430_v0 }
  0x6c   :  { %491 = vmatprep.subr.bf16.mxu1 %v821_v1  ;;  %718 = vmatprep.subr.bf16.mxu0 %v836_v38 }
  0x73   :  { %492 = vmatpush1.bf16.xpose.msra.mxu1 %v819_v3  ;;  %719 = vmatpush3.bf16.xpose.msra.mxu0 %v433_v4 }
  0x74   :  { %493 = vmatprep.subr.bf16.mxu1 %v825_v5  ;;  %720 = vmatprep.subr.bf16.mxu0 %v836_v38 }
  0x7b   :  { %494 = vmatpush1.bf16.xpose.msra.mxu1 %v823_v7  ;;  %721 = vmatpush3.bf16.xpose.msra.mxu0 %v436_v8 }
  0x82   :  { %512 = vmatmul.mubr.bf16.vlgmr.msra.gmra.mrb[0].mxu1 %v827_v9  ;;  %723 = vmatmul.mubr.msk.bf16.vlgmr.msra.gmra.mrb[0].mxu0 %vm410_vm0, %v830_v10 }
  0x88   :  { %v616_v12 = vpop.permute.xlu0 %615 }
  0x8c   :  { %v621_v26 = vpop.permute.xlu0 %620 }
 0x155   :  { %v513_v13 = vpop.f32.mrb[0].mxu1  ;;  %v595_v14 = vpop.f32.mrb[0].mxu0 }
 0x156   :  { %v726_v15 = vadd.f32 %v595_v14, %v513_v13  ;;  %v515_v16 = vpop.f32.mrb[1].mxu1  ;;  %v724_v17 = vpop.f32.mrb[1].mxu0 }
 0x157   :  { %v516_v18 = vpop.f32.mrb[2].mxu1  ;;  %v598_v20 = vpop.f32.mrb[2].mxu0 }
 0x158   :  { %v727_v21 = vadd.f32 %v598_v20, %v516_v18  ;;  %v518_v22 = vpop.f32.mrb[3].mxu1  ;;  %v725_v23 = vpop.f32.mrb[3].mxu0  ;;  %v623_v25 = vadd.f32 %v726_v15, %v616_v12 }
 0x15a   :  { %v603_v24 = vmax.f32 %v30_v19, %v727_v21  ;;  %831 = vtanh.f32 %v623_v25 }
 0x15c   :  { %605 = vst [vmem:[%s1093_s3 + $0x8] sm:$0x3] %v603_v24 }
 0x163   :  { %v610_v27 = vld [vmem:[%s1093_s3 + $0x8] sm:$0x3] }
 0x164   :  { %v624_v28 = vadd.f32 %v621_v26, %v610_v27  ;;  %v832_v29 = vpop.eup %831 }
 0x165   :  { %627 = vst [vmem:[%s1093_s3] sm:$0xff] %v832_v29 }
 0x166   :  { %833 = vtanh.f32 %v624_v28 }
 0x170   :  { %v834_v30 = vpop.eup %833 }
 0x171   :  { %628 = vst [vmem:[%s1093_s3 + $0x8] sm:$0x3] %v834_v30 }

</bundles_post_ra>
